<compile_context>
chip_gen: v7x
topology: tpu7x:2x2x1
jax: 0.10.0
libtpu: 0.0.40
codegen_flags: <defaults>
</compile_context>

<pallas_src>
import math

import jax
import jax.numpy as jnp
import numpy as np
from jax import lax
from jax.experimental import pallas as pl
from jax.experimental.pallas import tpu as pltpu

EPS = 1e-5          # nn.InstanceNorm2d default eps
NEG_SLOPE = 0.2     # nn.LeakyReLU(0.2)
INV_SQRT2 = 1.0 / math.sqrt(2.0)


def _make_kernel(H, W):
    HW = H * W

    def kernel(x_ref, m_ref, gb_ref, w1_ref, w2_ref, b2_ref, out_ref):
        x = x_ref[...]                                    # (N*Cin, HW) lane-dense
        m = m_ref[...]                                    # (4, HW) boundary masks
        ml, mr, mt, mb = m[0:1], m[1:2], m[2:3], m[3:4]   # x>0, x<W-1, y>0, y<H-1

        g1, be1 = gb_ref[:, 0:1], gb_ref[:, 1:2]
        g2, be2 = gb_ref[:, 2:3], gb_ref[:, 3:4]

        def inorm_lrelu(a, g, b):
            # folded-affine InstanceNorm (biased var, eps=1e-5) + LeakyReLU(0.2)
            mean = jnp.mean(a, axis=1, keepdims=True)
            var = jnp.mean(a * a, axis=1, keepdims=True) - mean * mean
            scale = g * lax.rsqrt(var + EPS)              # EUP rsqrt
            shift = b - mean * scale
            y = a * scale + shift
            return jnp.where(y > 0, y, NEG_SLOPE * y)

        def taps(a):
            # 3x3 'same' im2col taps via lane rolls + masks (order: ky, kx).
            # tap(dy,dx)[p] = a[p + dy*W + dx], zero outside the image.
            left = pltpu.roll(a, 1, 1) * ml               # value from x-1
            right = pltpu.roll(a, HW - 1, 1) * mr         # value from x+1
            cols = (left, a, right)
            out = []
            for ky in range(3):
                for kx in range(3):
                    c = cols[kx]
                    if ky == 0:
                        t = pltpu.roll(c, W, 1) * mt      # value from y-1
                    elif ky == 2:
                        t = pltpu.roll(c, HW - W, 1) * mb  # value from y+1
                    else:
                        t = c
                    out.append(t)
            return out

        # norm1 -> leaky_relu -> conv1  (bias dropped: cancelled by norm2's mean)
        a1 = inorm_lrelu(x, g1, be1)
        col1 = jnp.concatenate(taps(a1), axis=0)          # (9*N*Cin, HW)
        h = jnp.dot(w1_ref[...], col1,
                    preferred_element_type=jnp.float32)   # (N*Cin, HW)

        # norm2 -> leaky_relu -> [conv2 | 1x1 skip] as ONE fused matmul
        a2 = inorm_lrelu(h, g2, be2)
        col2 = jnp.concatenate(taps(a2) + [x], axis=0)    # (10*N*Cin, HW)
        out = jnp.dot(w2_ref[...], col2,
                      preferred_element_type=jnp.float32)  # (N*Cout, HW)

        # (conv2 + b2 + skip) / sqrt(2); b2_ref is pre-scaled by 1/sqrt(2)
        out_ref[...] = (out * INV_SQRT2 + b2_ref[...]).astype(out_ref.dtype)

    return kernel


def _block_diag_taps(wf, n_batch, cin):
    """(O, 9*Cin) tap-major weight -> per-batch block-diagonal (n*O, 9*n*Cin)."""
    o = wf.shape[0]
    wf3 = wf.reshape(o, 9, cin)
    eye = jnp.eye(n_batch, dtype=wf.dtype)
    big = eye[:, None, None, :, None] * wf3[None, :, :, None, :]  # (n,O,9,n,Cin)
    return big.reshape(n_batch * o, 9 * n_batch * cin)


def residual_block(x, params):
    """x: (N, Cin, H, W) float32 (NCHW, like PyTorch) -> (N, Cout, H, W)."""
    N, Cin, H, W = x.shape
    Cout = params["w2"].shape[0]
    HW = H * W
    NC = N * Cin

    kernel = _make_kernel(H, W)

    x2d = x.reshape(NC, HW).astype(jnp.float32)

    # flattened per-tap weights: wf[o, (ky*3+kx)*Cin + i] = w[o, i, ky, kx]
    w1f = jnp.transpose(params["w1"], (0, 2, 3, 1)).reshape(Cin, 9 * Cin)
    w2f = jnp.transpose(params["w2"], (0, 2, 3, 1)).reshape(Cout, 9 * Cin)

    w1big = _block_diag_taps(w1f, N, Cin)                        # (N*Cin, 9*N*Cin)
    wadd2 = params["wadd"].reshape(Cout, Cin)
    wadd_big = (jnp.eye(N, dtype=jnp.float32)[:, None, :, None]
                * wadd2[None, :, None, :]).reshape(N * Cout, N * Cin)
    w2big = jnp.concatenate([_block_diag_taps(w2f, N, Cin), wadd_big],
                            axis=1)                              # (N*Cout, 10*N*Cin)

    # packed per-row norm params: columns = [gamma1, beta1, gamma2, beta2]
    gb1 = jnp.stack([params["g1"], params["be1"], params["g2"], params["be2"]],
                    axis=1).astype(jnp.float32)                  # (Cin, 4)
    gb = jnp.tile(gb1, (N, 1))                                   # (N*Cin, 4)

    # conv2 bias, pre-scaled by 1/sqrt(2), one row per (n, out-channel)
    b2big = (jnp.tile(params["b2"], N).reshape(N * Cout, 1)
             * INV_SQRT2).astype(jnp.float32)

    # boundary-validity masks (rows: x>0, x<W-1, y>0, y<H-1)
    ys, xs = np.divmod(np.arange(HW), W)
    masks = jnp.asarray(np.stack([(xs > 0), (xs < W - 1),
                                  (ys > 0), (ys < H - 1)]).astype(np.float32))

    out = pl.pallas_call(
        kernel,
        out_shape=jax.ShapeDtypeStruct((N * Cout, HW), jnp.float32),
        grid=(1,),
        in_specs=[
            pl.BlockSpec((NC, HW), lambda i: (0, 0)),
            pl.BlockSpec((4, HW), lambda i: (0, 0)),
            pl.BlockSpec((NC, 4), lambda i: (0, 0)),
            pl.BlockSpec((NC, 9 * NC), lambda i: (0, 0)),
            pl.BlockSpec((N * Cout, 10 * NC), lambda i: (0, 0)),
            pl.BlockSpec((N * Cout, 1), lambda i: (0, 0)),
        ],
        out_specs=pl.BlockSpec((N * Cout, HW), lambda i: (0, 0)),
        compiler_params=pltpu.CompilerParams(
            dimension_semantics=("arbitrary",),
        ),
    )(x2d, masks, gb, w1big, w2big, b2big)

    return out.reshape(N, Cout, H, W)


def reference(x, params):
    """Pure-JAX NCHW reference of ResidualBlock.forward (default config)."""
    def inorm(v, g, b):
        mean = v.mean(axis=(2, 3), keepdims=True)
        var = ((v - mean) ** 2).mean(axis=(2, 3), keepdims=True)
        return (v - mean) / jnp.sqrt(var + EPS) * g.reshape(1, -1, 1, 1) \
            + b.reshape(1, -1, 1, 1)

    def lrelu(v):
        return jnp.where(v > 0, v, NEG_SLOPE * v)

    def conv(v, w, b=None):
        y = jax.lax.conv_general_dilated(
            v, w, window_strides=(1, 1), padding="SAME",
            dimension_numbers=("NCHW", "OIHW", "NCHW"))
        if b is not None:
            y = y + b.reshape(1, -1, 1, 1)
        return y

    out = inorm(x, params["g1"], params["be1"])
    out = lrelu(out)
    out = conv(out, params["w1"], params["b1"])
    out = inorm(out, params["g2"], params["be2"])
    out = lrelu(out)
    out = conv(out, params["w2"], params["b2"])
    identity = conv(x, params["wadd"])
    return (out + identity) * INV_SQRT2


if __name__ == "__main__":
    N, H, W = 2, 16, 16
    Cin, Cout = 4, 8

    key = jax.random.PRNGKey(0)
    keys = jax.random.split(key, 10)

    params = {
        "g1":   1.0 + 0.1 * jax.random.normal(keys[0], (Cin,), jnp.float32),
        "be1":  0.1 * jax.random.normal(keys[1], (Cin,), jnp.float32),
        "w1":   0.2 * jax.random.normal(keys[2], (Cin, Cin, 3, 3), jnp.float32),
        "b1":   0.05 * jax.random.normal(keys[3], (Cin,), jnp.float32),
        "g2":   1.0 + 0.1 * jax.random.normal(keys[4], (Cin,), jnp.float32),
        "be2":  0.1 * jax.random.normal(keys[5], (Cin,), jnp.float32),
        "w2":   0.2 * jax.random.normal(keys[6], (Cout, Cin, 3, 3), jnp.float32),
        "b2":   0.05 * jax.random.normal(keys[7], (Cout,), jnp.float32),
        "wadd": 0.3 * jax.random.normal(keys[8], (Cout, Cin, 1, 1), jnp.float32),
    }
    x = jax.random.normal(keys[9], (N, Cin, H, W), jnp.float32)

    # TODO(synk): block_type='upsample'/'downsample' (nn.Upsample / AvgPool2d) and
    # AdaIn (norm_type != 'in') branches are not exercised; default config only.

    y = jax.block_until_ready(residual_block(x, params))
    y_ref = jax.block_until_ready(reference(x, params))
    np.testing.assert_allclose(np.asarray(y), np.asarray(y_ref),
                               rtol=2e-3, atol=2e-3)
    print("KERNEL_OK")
</pallas_src>

<mosaic_0001>
module attributes {stable_mosaic.version = 11 : i64} {
  func.func @kernel(%arg0: i32, %arg1: memref<8x256xf32, #tpu.memory_space<vmem>>, %arg2: memref<4x256xf32, #tpu.memory_space<vmem>>, %arg3: memref<8x4xf32, #tpu.memory_space<vmem>>, %arg4: memref<8x72xf32, #tpu.memory_space<vmem>>, %arg5: memref<16x80xf32, #tpu.memory_space<vmem>>, %arg6: memref<16x1xf32, #tpu.memory_space<vmem>>, %arg7: memref<16x256xf32, #tpu.memory_space<vmem>>) attributes {dimension_semantics = [#tpu.dimension_semantics<arbitrary>], iteration_bounds = array<i64: 1>, scalar_prefetch = 0 : i64, scratch_operands = 0 : i64, tpu.core_type = #tpu.core_type<tc>, window_params = [{pipeline_mode = #tpu.pipeline_mode<synchronous>, transform_indices = @transform_0, window_bounds = array<i64: 8, 256>}, {pipeline_mode = #tpu.pipeline_mode<synchronous>, transform_indices = @transform_1, window_bounds = array<i64: 4, 256>}, {pipeline_mode = #tpu.pipeline_mode<synchronous>, transform_indices = @transform_2, window_bounds = array<i64: 8, 4>}, {pipeline_mode = #tpu.pipeline_mode<synchronous>, transform_indices = @transform_3, window_bounds = array<i64: 8, 72>}, {pipeline_mode = #tpu.pipeline_mode<synchronous>, transform_indices = @transform_4, window_bounds = array<i64: 16, 80>}, {pipeline_mode = #tpu.pipeline_mode<synchronous>, transform_indices = @transform_5, window_bounds = array<i64: 16, 1>}, {pipeline_mode = #tpu.pipeline_mode<synchronous>, transform_indices = @transform_6, window_bounds = array<i64: 16, 256>}]} {
    %c0 = arith.constant 0 : index
    %c0_0 = arith.constant 0 : index
    %0 = vector.load %arg1[%c0, %c0_0] : memref<8x256xf32, #tpu.memory_space<vmem>>, vector<8x256xf32>
    %c0_1 = arith.constant 0 : index
    %c0_2 = arith.constant 0 : index
    %1 = vector.load %arg2[%c0_1, %c0_2] : memref<4x256xf32, #tpu.memory_space<vmem>>, vector<4x256xf32>
    %2 = vector.extract_strided_slice %1 {offsets = [0, 0], sizes = [1, 256], strides = [1, 1]} : vector<4x256xf32> to vector<1x256xf32>
    %3 = vector.extract_strided_slice %1 {offsets = [1, 0], sizes = [1, 256], strides = [1, 1]} : vector<4x256xf32> to vector<1x256xf32>
    %4 = vector.extract_strided_slice %1 {offsets = [2, 0], sizes = [1, 256], strides = [1, 1]} : vector<4x256xf32> to vector<1x256xf32>
    %5 = vector.extract_strided_slice %1 {offsets = [3, 0], sizes = [1, 256], strides = [1, 1]} : vector<4x256xf32> to vector<1x256xf32>
    %c0_3 = arith.constant 0 : index
    %c0_4 = arith.constant 0 : index
    %6 = vector.load %arg3[%c0_3, %c0_4] : memref<8x4xf32, #tpu.memory_space<vmem>>, vector<8x1xf32>
    %c0_5 = arith.constant 0 : index
    %c1 = arith.constant 1 : index
    %7 = vector.load %arg3[%c0_5, %c1] : memref<8x4xf32, #tpu.memory_space<vmem>>, vector<8x1xf32>
    %c0_6 = arith.constant 0 : index
    %c2 = arith.constant 2 : index
    %8 = vector.load %arg3[%c0_6, %c2] : memref<8x4xf32, #tpu.memory_space<vmem>>, vector<8x1xf32>
    %c0_7 = arith.constant 0 : index
    %c3 = arith.constant 3 : index
    %9 = vector.load %arg3[%c0_7, %c3] : memref<8x4xf32, #tpu.memory_space<vmem>>, vector<8x1xf32>
    %cst = arith.constant dense<0.000000e+00> : vector<8xf32>
    %10 = vector.multi_reduction <add>, %0, %cst [1] : vector<8x256xf32> to vector<8xf32>
    %11 = vector.shape_cast %10 : vector<8xf32> to vector<8x1xf32>
    %cst_8 = arith.constant 2.560000e+02 : f32
    %12 = vector.broadcast %cst_8 : f32 to vector<8x1xf32>
    %13 = arith.divf %11, %12 : vector<8x1xf32>
    %14 = arith.mulf %0, %0 : vector<8x256xf32>
    %cst_9 = arith.constant dense<0.000000e+00> : vector<8xf32>
    %15 = vector.multi_reduction <add>, %14, %cst_9 [1] : vector<8x256xf32> to vector<8xf32>
    %16 = vector.shape_cast %15 : vector<8xf32> to vector<8x1xf32>
    %cst_10 = arith.constant 2.560000e+02 : f32
    %17 = vector.broadcast %cst_10 : f32 to vector<8x1xf32>
    %18 = arith.divf %16, %17 : vector<8x1xf32>
    %19 = arith.mulf %13, %13 : vector<8x1xf32>
    %20 = arith.subf %18, %19 : vector<8x1xf32>
    %cst_11 = arith.constant 9.99999974E-6 : f32
    %21 = vector.broadcast %cst_11 : f32 to vector<8x1xf32>
    %22 = arith.addf %20, %21 : vector<8x1xf32>
    %23 = math.rsqrt %22 : vector<8x1xf32>
    %24 = arith.mulf %6, %23 : vector<8x1xf32>
    %25 = arith.mulf %13, %24 : vector<8x1xf32>
    %26 = arith.subf %7, %25 : vector<8x1xf32>
    %27 = vector.broadcast %24 : vector<8x1xf32> to vector<8x256xf32>
    %28 = arith.mulf %0, %27 : vector<8x256xf32>
    %29 = vector.broadcast %26 : vector<8x1xf32> to vector<8x256xf32>
    %30 = arith.addf %28, %29 : vector<8x256xf32>
    %cst_12 = arith.constant 0.000000e+00 : f32
    %31 = vector.broadcast %cst_12 : f32 to vector<8x256xf32>
    %32 = arith.cmpf ogt, %30, %31 : vector<8x256xf32>
    %cst_13 = arith.constant 2.000000e-01 : f32
    %33 = vector.broadcast %cst_13 : f32 to vector<8x256xf32>
    %34 = arith.mulf %33, %30 : vector<8x256xf32>
    %35 = arith.select %32, %30, %34 : vector<8x256xi1>, vector<8x256xf32>
    %c1_i32 = arith.constant 1 : i32
    %36 = tpu.dynamic_rotate %35 by %c1_i32 dim 1 : vector<8x256xf32>, i32 -> vector<8x256xf32>
    %37 = vector.broadcast %2 : vector<1x256xf32> to vector<8x256xf32>
    %38 = arith.mulf %36, %37 : vector<8x256xf32>
    %c255_i32 = arith.constant 255 : i32
    %39 = tpu.dynamic_rotate %35 by %c255_i32 dim 1 : vector<8x256xf32>, i32 -> vector<8x256xf32>
    %40 = vector.broadcast %3 : vector<1x256xf32> to vector<8x256xf32>
    %41 = arith.mulf %39, %40 : vector<8x256xf32>
    %c16_i32 = arith.constant 16 : i32
    %42 = tpu.dynamic_rotate %38 by %c16_i32 dim 1 : vector<8x256xf32>, i32 -> vector<8x256xf32>
    %43 = vector.broadcast %4 : vector<1x256xf32> to vector<8x256xf32>
    %44 = arith.mulf %42, %43 : vector<8x256xf32>
    %c16_i32_14 = arith.constant 16 : i32
    %45 = tpu.dynamic_rotate %35 by %c16_i32_14 dim 1 : vector<8x256xf32>, i32 -> vector<8x256xf32>
    %46 = vector.broadcast %4 : vector<1x256xf32> to vector<8x256xf32>
    %47 = arith.mulf %45, %46 : vector<8x256xf32>
    %c16_i32_15 = arith.constant 16 : i32
    %48 = tpu.dynamic_rotate %41 by %c16_i32_15 dim 1 : vector<8x256xf32>, i32 -> vector<8x256xf32>
    %49 = vector.broadcast %4 : vector<1x256xf32> to vector<8x256xf32>
    %50 = arith.mulf %48, %49 : vector<8x256xf32>
    %c240_i32 = arith.constant 240 : i32
    %51 = tpu.dynamic_rotate %38 by %c240_i32 dim 1 : vector<8x256xf32>, i32 -> vector<8x256xf32>
    %52 = vector.broadcast %5 : vector<1x256xf32> to vector<8x256xf32>
    %53 = arith.mulf %51, %52 : vector<8x256xf32>
    %c240_i32_16 = arith.constant 240 : i32
    %54 = tpu.dynamic_rotate %35 by %c240_i32_16 dim 1 : vector<8x256xf32>, i32 -> vector<8x256xf32>
    %55 = vector.broadcast %5 : vector<1x256xf32> to vector<8x256xf32>
    %56 = arith.mulf %54, %55 : vector<8x256xf32>
    %c240_i32_17 = arith.constant 240 : i32
    %57 = tpu.dynamic_rotate %41 by %c240_i32_17 dim 1 : vector<8x256xf32>, i32 -> vector<8x256xf32>
    %58 = vector.broadcast %5 : vector<1x256xf32> to vector<8x256xf32>
    %59 = arith.mulf %57, %58 : vector<8x256xf32>
    %60 = tpu.concatenate %44, %47, %50, %38, %35, %41, %53, %56, %59 in 0 : vector<8x256xf32>, vector<8x256xf32>, vector<8x256xf32>, vector<8x256xf32>, vector<8x256xf32>, vector<8x256xf32>, vector<8x256xf32>, vector<8x256xf32>, vector<8x256xf32> -> vector<72x256xf32>
    %c0_18 = arith.constant 0 : index
    %c0_19 = arith.constant 0 : index
    %61 = vector.load %arg4[%c0_18, %c0_19] : memref<8x72xf32, #tpu.memory_space<vmem>>, vector<8x72xf32>
    %cst_20 = arith.constant dense<0.000000e+00> : vector<8x256xf32>
    %62 = tpu.matmul %61, %60, %cst_20 {dimension_numbers = #tpu.dot_dimension_numbers<[1], [0], [0], [1], [0, 0, 1, 1], [], []>} : vector<8x72xf32>, vector<72x256xf32>, vector<8x256xf32> -> vector<8x256xf32>
    %cst_21 = arith.constant dense<0.000000e+00> : vector<8xf32>
    %63 = vector.multi_reduction <add>, %62, %cst_21 [1] : vector<8x256xf32> to vector<8xf32>
    %64 = vector.shape_cast %63 : vector<8xf32> to vector<8x1xf32>
    %cst_22 = arith.constant 2.560000e+02 : f32
    %65 = vector.broadcast %cst_22 : f32 to vector<8x1xf32>
    %66 = arith.divf %64, %65 : vector<8x1xf32>
    %67 = arith.mulf %62, %62 : vector<8x256xf32>
    %cst_23 = arith.constant dense<0.000000e+00> : vector<8xf32>
    %68 = vector.multi_reduction <add>, %67, %cst_23 [1] : vector<8x256xf32> to vector<8xf32>
    %69 = vector.shape_cast %68 : vector<8xf32> to vector<8x1xf32>
    %cst_24 = arith.constant 2.560000e+02 : f32
    %70 = vector.broadcast %cst_24 : f32 to vector<8x1xf32>
    %71 = arith.divf %69, %70 : vector<8x1xf32>
    %72 = arith.mulf %66, %66 : vector<8x1xf32>
    %73 = arith.subf %71, %72 : vector<8x1xf32>
    %cst_25 = arith.constant 9.99999974E-6 : f32
    %74 = vector.broadcast %cst_25 : f32 to vector<8x1xf32>
    %75 = arith.addf %73, %74 : vector<8x1xf32>
    %76 = math.rsqrt %75 : vector<8x1xf32>
    %77 = arith.mulf %8, %76 : vector<8x1xf32>
    %78 = arith.mulf %66, %77 : vector<8x1xf32>
    %79 = arith.subf %9, %78 : vector<8x1xf32>
    %80 = vector.broadcast %77 : vector<8x1xf32> to vector<8x256xf32>
    %81 = arith.mulf %62, %80 : vector<8x256xf32>
    %82 = vector.broadcast %79 : vector<8x1xf32> to vector<8x256xf32>
    %83 = arith.addf %81, %82 : vector<8x256xf32>
    %cst_26 = arith.constant 0.000000e+00 : f32
    %84 = vector.broadcast %cst_26 : f32 to vector<8x256xf32>
    %85 = arith.cmpf ogt, %83, %84 : vector<8x256xf32>
    %cst_27 = arith.constant 2.000000e-01 : f32
    %86 = vector.broadcast %cst_27 : f32 to vector<8x256xf32>
    %87 = arith.mulf %86, %83 : vector<8x256xf32>
    %88 = arith.select %85, %83, %87 : vector<8x256xi1>, vector<8x256xf32>
    %c1_i32_28 = arith.constant 1 : i32
    %89 = tpu.dynamic_rotate %88 by %c1_i32_28 dim 1 : vector<8x256xf32>, i32 -> vector<8x256xf32>
    %90 = vector.broadcast %2 : vector<1x256xf32> to vector<8x256xf32>
    %91 = arith.mulf %89, %90 : vector<8x256xf32>
    %c255_i32_29 = arith.constant 255 : i32
    %92 = tpu.dynamic_rotate %88 by %c255_i32_29 dim 1 : vector<8x256xf32>, i32 -> vector<8x256xf32>
    %93 = vector.broadcast %3 : vector<1x256xf32> to vector<8x256xf32>
    %94 = arith.mulf %92, %93 : vector<8x256xf32>
    %c16_i32_30 = arith.constant 16 : i32
    %95 = tpu.dynamic_rotate %91 by %c16_i32_30 dim 1 : vector<8x256xf32>, i32 -> vector<8x256xf32>
    %96 = vector.broadcast %4 : vector<1x256xf32> to vector<8x256xf32>
    %97 = arith.mulf %95, %96 : vector<8x256xf32>
    %c16_i32_31 = arith.constant 16 : i32
    %98 = tpu.dynamic_rotate %88 by %c16_i32_31 dim 1 : vector<8x256xf32>, i32 -> vector<8x256xf32>
    %99 = vector.broadcast %4 : vector<1x256xf32> to vector<8x256xf32>
    %100 = arith.mulf %98, %99 : vector<8x256xf32>
    %c16_i32_32 = arith.constant 16 : i32
    %101 = tpu.dynamic_rotate %94 by %c16_i32_32 dim 1 : vector<8x256xf32>, i32 -> vector<8x256xf32>
    %102 = vector.broadcast %4 : vector<1x256xf32> to vector<8x256xf32>
    %103 = arith.mulf %101, %102 : vector<8x256xf32>
    %c240_i32_33 = arith.constant 240 : i32
    %104 = tpu.dynamic_rotate %91 by %c240_i32_33 dim 1 : vector<8x256xf32>, i32 -> vector<8x256xf32>
    %105 = vector.broadcast %5 : vector<1x256xf32> to vector<8x256xf32>
    %106 = arith.mulf %104, %105 : vector<8x256xf32>
    %c240_i32_34 = arith.constant 240 : i32
    %107 = tpu.dynamic_rotate %88 by %c240_i32_34 dim 1 : vector<8x256xf32>, i32 -> vector<8x256xf32>
    %108 = vector.broadcast %5 : vector<1x256xf32> to vector<8x256xf32>
    %109 = arith.mulf %107, %108 : vector<8x256xf32>
    %c240_i32_35 = arith.constant 240 : i32
    %110 = tpu.dynamic_rotate %94 by %c240_i32_35 dim 1 : vector<8x256xf32>, i32 -> vector<8x256xf32>
    %111 = vector.broadcast %5 : vector<1x256xf32> to vector<8x256xf32>
    %112 = arith.mulf %110, %111 : vector<8x256xf32>
    %113 = tpu.concatenate %97, %100, %103, %91, %88, %94, %106, %109, %112, %0 in 0 : vector<8x256xf32>, vector<8x256xf32>, vector<8x256xf32>, vector<8x256xf32>, vector<8x256xf32>, vector<8x256xf32>, vector<8x256xf32>, vector<8x256xf32>, vector<8x256xf32>, vector<8x256xf32> -> vector<80x256xf32>
    %c0_36 = arith.constant 0 : index
    %c0_37 = arith.constant 0 : index
    %114 = vector.load %arg5[%c0_36, %c0_37] : memref<16x80xf32, #tpu.memory_space<vmem>>, vector<16x80xf32>
    %cst_38 = arith.constant dense<0.000000e+00> : vector<16x256xf32>
    %115 = tpu.matmul %114, %113, %cst_38 {dimension_numbers = #tpu.dot_dimension_numbers<[1], [0], [0], [1], [0, 0, 1, 1], [], []>} : vector<16x80xf32>, vector<80x256xf32>, vector<16x256xf32> -> vector<16x256xf32>
    %cst_39 = arith.constant 0.707106769 : f32
    %116 = vector.broadcast %cst_39 : f32 to vector<16x256xf32>
    %117 = arith.mulf %115, %116 : vector<16x256xf32>
    %c0_40 = arith.constant 0 : index
    %c0_41 = arith.constant 0 : index
    %118 = vector.load %arg6[%c0_40, %c0_41] : memref<16x1xf32, #tpu.memory_space<vmem>>, vector<16x1xf32>
    %119 = vector.broadcast %118 : vector<16x1xf32> to vector<16x256xf32>
    %120 = arith.addf %117, %119 : vector<16x256xf32>
    %c0_42 = arith.constant 0 : index
    %c0_43 = arith.constant 0 : index
    %121 = vector.load %arg7[%c0_42, %c0_43] : memref<16x256xf32, #tpu.memory_space<vmem>>, vector<16x256xf32>
    tpu.vector_store %arg7[%c0_42, %c0_43], %120 {strides = array<i32>} : memref<16x256xf32, #tpu.memory_space<vmem>>, vector<16x256xf32>,
    return
  }
  func.func @transform_0(%arg0: i32) -> (i32, i32) {
    %c0_i32 = arith.constant 0 : i32
    %c0_i32_0 = arith.constant 0 : i32
    %c0_i32_1 = arith.constant 0 : i32
    return %c0_i32, %c0_i32_0 : i32, i32
  }
  func.func @transform_1(%arg0: i32) -> (i32, i32) {
    %c0_i32 = arith.constant 0 : i32
    %c0_i32_0 = arith.constant 0 : i32
    %c0_i32_1 = arith.constant 0 : i32
    return %c0_i32, %c0_i32_0 : i32, i32
  }
  func.func @transform_2(%arg0: i32) -> (i32, i32) {
    %c0_i32 = arith.constant 0 : i32
    %c0_i32_0 = arith.constant 0 : i32
    %c0_i32_1 = arith.constant 0 : i32
    return %c0_i32, %c0_i32_0 : i32, i32
  }
  func.func @transform_3(%arg0: i32) -> (i32, i32) {
    %c0_i32 = arith.constant 0 : i32
    %c0_i32_0 = arith.constant 0 : i32
    %c0_i32_1 = arith.constant 0 : i32
    return %c0_i32, %c0_i32_0 : i32, i32
  }
  func.func @transform_4(%arg0: i32) -> (i32, i32) {
    %c0_i32 = arith.constant 0 : i32
    %c0_i32_0 = arith.constant 0 : i32
    %c0_i32_1 = arith.constant 0 : i32
    return %c0_i32, %c0_i32_0 : i32, i32
  }
  func.func @transform_5(%arg0: i32) -> (i32, i32) {
    %c0_i32 = arith.constant 0 : i32
    %c0_i32_0 = arith.constant 0 : i32
    %c0_i32_1 = arith.constant 0 : i32
    return %c0_i32, %c0_i32_0 : i32, i32
  }
  func.func @transform_6(%arg0: i32) -> (i32, i32) {
    %c0_i32 = arith.constant 0 : i32
    %c0_i32_0 = arith.constant 0 : i32
    %c0_i32_1 = arith.constant 0 : i32
    return %c0_i32, %c0_i32_0 : i32, i32
  }
}

</mosaic_0001>

<bundles_post_ra>
// kernel: tpu_custom_call.1
= control target key start
LH: loop header
LB: loop body
LE: loop exit
PB: predicated region body
PF: predicated region fallthrough
CT: control target
= control target key end

     0   :  { %11 = vsyncpa [#allocation3], 0  ;;  %s979_s0 = inlined_call_operand.vmem [shape: f32[8,256], index: 0, kind: input, shape index: {}]   ;;  %s980_s1 = inlined_call_operand.hbm [shape: f32[4,256], index: 1, kind: input, shape index: {}]   ;;  %s981_s2 = inlined_call_operand.vmem [shape: f32[8,4], index: 2, kind: input, shape index: {}]   ;;  %s982_s3 = inlined_call_operand.vmem [shape: f32[8,72], index: 3, kind: input, shape index: {}]   ;;  %s983_s4 = inlined_call_operand.vmem [shape: f32[16,80], index: 4, kind: input, shape index: {}]   ;;  %s984_s5 = inlined_call_operand.vmem [shape: f32[16,1], index: 5, kind: input, shape index: {}]   ;;  %s985_s6 = inlined_call_operand.hbm [shape: f32[16,256], index: 6, kind: output, shape index: {}]  }
   0x1   :  { %12 = vsyncpa [#allocation4], 0  ;;  %s642_s21 = smov [#allocation2]   ;;  %s594_s25 = scalar_lea.hbm %s980_s1, 128 }
   0x2   :  { %s21_s22 = sshll.u32 %s642_s21, 4  ;;  %p595_p0 = scmp.ne.s32.totalorder %s980_s1, %s594_s25  ;;  %s22_s22 = int_to_ptr.vmem [resolvable:$true] %s21_s22 }
   0x3   :  { %p598_p1 = scmp.lt.u32.totalorder %s594_s25, %s980_s1 }
   0x5   :  { %p600_p2 = pnand %p598_p1, %p595_p0 }
   0x7   :  { %603 = shalt.err (!%p600_p2)
}
   0x8   :  { %s604_s30 = scalar_lea.vmem %s22_s22, 128  ;;  %p609_p4 = scmp.lt.s32.totalorder %s22_s22, %s22_s22 }
   0x9   :  { %p605_p3 = scmp.ne.s32.totalorder %s22_s22, %s604_s30  ;;  %p610_p5 = scmp.lt.s32.totalorder %s604_s30, %s604_s30 }
   0xb   :  { %p611_p6 = por %p610_p5, %p609_p4 }
   0xd   :  { %p612_p7 = pnand %p611_p6, %p605_p3 }
   0xf   :  { %615 = shalt.err (!%p612_p7)
}
  0x10   :  { %24 = dma.hbm_to_vmem [thread:$0]  %s980_s1, 128, %s22_s22, [#allocation3]  }
  0x11   :  { %638 = dma.done.wait [#allocation3], 128  }
  0x12   :  { %639 = vsyncadd [#allocation3], 4294967168  ;;  %v704_v0 = vld [vmem:[%s979_s0] sm:$0xff]  ;;  %v709_v1 = vld [vmem:[%s979_s0 + $0x8] sm:$0xff]  ;;  %v643_v6 = vmov 0   ;;  %v644_v14 = vmov 1   ;;  %v86_v31 = vlaneseq }
  0x13   :  { %v40_v2 = vadd.f32 %v709_v1, %v704_v0  ;;  %v45_v3 = vmul.f32 %v704_v0, %v704_v0  ;;  %v46_v4 = vmul.f32 %v709_v1, %v709_v1  ;;  %584 = vset.pattern.permute.xlu1 %v643_v6  ;;  %585 = vset.pattern.permute.xlu0 %v644_v14  ;;  %v721_v15 = vld [vmem:[%s981_s2] sm:$0xff]  ;;  %s645_s13 = smov 1   ;;  %s646_s2 = smov 127   ;;  %v649_v59 = vmov 0.0  }
  0x14   :  { %s647_s14 = smov 16   ;;  %v745_v32 = vshrl.u32 %v86_v31, 7  ;;  %v749_v35 = vld [vmem:[#allocation2] sm:$0xff]  ;;  %v751_v36 = vand.u32 127, %v86_v31  ;;  %s648_s15 = smov 112   ;;  %294 = vmatprep.mubr.f32.mxu0 %v649_v59  ;;  %479 = vmatprep.mubr.f32.mxu1 %v649_v59  ;;  %vm226_vm6 = vcmask 588800  }
  0x15   :  { %41 = vadd.xlane.f32.xlu0 %v40_v2  ;;  %v47_v5 = vadd.f32 %v46_v4, %v45_v3  ;;  %vm408_vm9 = vcmask 654336   ;;  %s652_s24 = smov [#allocation5]  }
  0x16   :  { %v94_v33 = vsub.s32 0, %v745_v32  ;;  %v98_v34 = vsub.s32 4, %v745_v32  ;;  %vm88_vm2 = vcmp.lt.s32.totalorder %v751_v36, 1  ;;  %v121_v42 = vsub.s32 1, %v745_v32  ;;  %s521_s25 = sshll.u32 %s652_s24, 4  ;;  %s522_s25 = int_to_ptr.vmem [resolvable:$true] %s521_s25 }
  0x17   :  { %v125_v43 = vsub.s32 5, %v745_v32  ;;  %vm116_vm3 = vcmp.lt.s32.totalorder %v751_v36, 127  ;;  %v148_v61 = vsub.s32 2, %v745_v32  ;;  %v152_v62 = vsub.s32 6, %v745_v32  ;;  %p621_p9 = scmp.lt.s32.totalorder %s522_s25, %s522_s25 }
  0x18   :  { %v95_v37 = vrot.slane %v749_v35, %v94_v33  ;;  %v99_v38 = vrot.slane %v749_v35, %v98_v34  ;;  %v122_v49 = vrot.slane %v749_v35, %v121_v42  ;;  %vm143_vm4 = vcmp.lt.s32.totalorder %v751_v36, 16 }
  0x19   :  { %48 = vadd.xlane.f32.xlu0 %v47_v5  ;;  %v126_v50 = vrot.slane %v749_v35, %v125_v43  ;;  %v149_v2 = vrot.slane %v749_v35, %v148_v61  ;;  %v153_v3 = vrot.slane %v749_v35, %v152_v62  ;;  %vm186_vm5 = vcmp.lt.s32.totalorder %v751_v36, 112  ;;  %v225_v62 = vld [vmem:[%s982_s3] sm:$0xff]  ;;  %v407_v36 = vld [vmem:[%s983_s4 + $0x8] sm:$0xff] }
  0x1a   :  { %v756_v40 = vrot.slane %v95_v37, %v94_v33  ;;  %v758_v41 = vrot.slane %v99_v38, %v94_v33  ;;  %v779_v52 = vrot.slane %v122_v49, %v121_v42 }
  0x1b   :  { %v781_v53 = vrot.slane %v126_v50, %v121_v42  ;;  %v812_v5 = vrot.slane %v149_v2, %v148_v61 }
  0xa2   :  { %v42_v7 = vpop.xlane.xlu0 %41 }
  0xa3   :  { %v44_v8 = vmul.f32 0.00390625, %v42_v7  ;;  %v814_v7 = vrot.slane %v153_v3, %v148_v61 }
  0xa5   :  { %v51_v10 = vmul.f32 %v44_v8, %v44_v8 }
  0xa6   :  { %v49_v9 = vpop.xlane.xlu0 %48 }
  0xa7   :  { %v50_v11 = vmul.f32 0.00390625, %v49_v9 }
  0xa9   :  { %v52_v12 = vsub.f32 %v50_v11, %v51_v10 }
  0xab   :  { %v53_v13 = vadd.f32 1e-05, %v52_v12 }
  0xad   :  { %590 = vrsqrt.f32 %v53_v13 }
  0xb7   :  { %v591_v16 = vpop.eup %590 }
  0xb8   :  { %v55_v17 = vmul.f32 %v591_v16, %v721_v15 }
  0xba   :  { %v56_v18 = vmul.f32 %v55_v17, %v44_v8 }
  0xbc   :  { %58 = vrot.lane.b32.xlu1 %v56_v18, %s645_s13 }
  0xc0   :  { %64 = vperm.xlu1 %584, %v55_v17  }
 0x12e   :  { %v59_v19 = vpop.permute.xlu1 %58 }
 0x12f   :  { %v61_v20 = vsub.f32 %v721_v15, %v59_v19 }
 0x131   :  { %71 = vperm.xlu0 %585, %v61_v20  }
 0x135   :  { %588 = vset.pattern.permute.xlu0 %v643_v6 }
 0x13f   :  { %v65_v21 = vpop.permute.xlu1 %64 }
 0x140   :  { %v67_v22 = vmul.f32 %v65_v21, %v704_v0  ;;  %v68_v23 = vmul.f32 %v65_v21, %v709_v1  ;;  %v191_v21 = vsub.s32 3, %v745_v32 }
 0x142   :  { %v192_v31 = vrot.slane %v749_v35, %v191_v21 }
 0x1b0   :  { %v72_v24 = vpop.permute.xlu0 %71 }
 0x1b1   :  { %v74_v25 = vadd.f32 %v72_v24, %v67_v22  ;;  %v75_v26 = vadd.f32 %v72_v24, %v68_v23  ;;  %v195_v22 = vsub.s32 7, %v745_v32 }
 0x1b3   :  { %vm76_vm0 = vcmp.gt.f32.partialorder %v74_v25, 0.0  ;;  %v78_v27 = vmul.f32 0.2, %v74_v25  ;;  %v79_v28 = vmul.f32 0.2, %v75_v26  ;;  %vm77_vm1 = vcmp.gt.f32.partialorder %v75_v26, 0.0 }
 0x1b4   :  { %v196_v33 = vrot.slane %v749_v35, %v195_v22  ;;  %v651_v22 = vmov 3  }
 0x1b5   :  { %v729_v29 = vsel %vm76_vm0, %v74_v25, %v78_v27  ;;  %v733_v30 = vsel %vm77_vm1, %v75_v26, %v79_v28 }
 0x1b6   :  { %82 = vrot.lane.b32.xlu1 %v729_v29, %s645_s13  ;;  %v843_v42 = vrot.slane %v196_v33, %v191_v21 }
 0x1ba   :  { %84 = vrot.lane.b32.xlu1 %v733_v30, %s645_s13 }
 0x1be   :  { %112 = vrot.lane.b32.xlu1 %v729_v29, %s646_s2 }
 0x1c2   :  { %114 = vrot.lane.b32.xlu1 %v733_v30, %s646_s2 }
 0x1c6   :  { %166 = vrot.lane.b32.xlu1 %v729_v29, %s647_s14 }
 0x1ca   :  { %168 = vrot.lane.b32.xlu1 %v733_v30, %s647_s14 }
 0x228   :  { %v83_v39 = vpop.permute.xlu1 %82 }
 0x22c   :  { %v85_v44 = vpop.permute.xlu1 %84 }
 0x22d   :  { %v89_v45 = vsel %vm88_vm2, %v83_v39, %v85_v44  ;;  %v90_v46 = vsel %vm88_vm2, %v85_v44, %v83_v39  ;;  %v841_v39 = vrot.slane %v192_v31, %v191_v21 }
 0x22e   :  { %v767_v47 = vmul.f32 %v756_v40, %v90_v46  ;;  %v770_v48 = vmul.f32 %v758_v41, %v89_v45 }
 0x230   :  { %139 = vrot.lane.b32.xlu1 %v767_v47, %s647_s14  ;;  %184 = vrot.lane.b32.xlu0 %v770_v48, %s648_s15  ;;  %v113_v51 = vpop.permute.xlu1 %112 }
 0x234   :  { %211 = vrot.lane.b32.xlu0 %v733_v30, %s648_s15  ;;  %141 = vrot.lane.b32.xlu1 %v770_v48, %s647_s14  ;;  %v115_v54 = vpop.permute.xlu1 %114 }
 0x235   :  { %v117_v55 = vsel %vm116_vm3, %v113_v51, %v115_v54  ;;  %v118_v56 = vsel %vm116_vm3, %v115_v54, %v113_v51 }
 0x236   :  { %v792_v57 = vmul.f32 %v779_v52, %v117_v55  ;;  %v138_v58 = vmul.f32 %v781_v53, %v118_v56 }
 0x238   :  { %219 = vrot.lane.b32.xlu0 %v138_v58, %s648_s15  ;;  %174 = vrot.lane.b32.xlu1 %v792_v57, %s647_s14  ;;  %v167_v60 = vpop.permute.xlu1 %166  ;;  %v544_v43 = vpack.c.bf16 %v138_v58, %v733_v30 }
 0x23c   :  { %176 = vrot.lane.b32.xlu1 %v138_v58, %s647_s14  ;;  %v169_v63 = vpop.permute.xlu1 %168 }
 0x23d   :  { %v170_v8 = vsel %vm143_vm4, %v167_v60, %v169_v63  ;;  %v171_v9 = vsel %vm143_vm4, %v169_v63, %v167_v60 }
 0x23e   :  { %v172_v13 = vmul.f32 %v171_v9, %v812_v5  ;;  %v173_v17 = vmul.f32 %v170_v8, %v814_v7 }
 0x240   :  { %182 = vrot.lane.b32.xlu1 %v767_v47, %s648_s15 }
 0x244   :  { %209 = vrot.lane.b32.xlu1 %v729_v29, %s648_s15 }
 0x248   :  { %217 = vrot.lane.b32.xlu1 %v792_v57, %s648_s15 }
 0x2a2   :  { %v140_v4 = vpop.permute.xlu1 %139  ;;  %v185_v23 = vpop.permute.xlu0 %184 }
 0x2a6   :  { %v142_v10 = vpop.permute.xlu1 %141  ;;  %v212_v38 = vpop.permute.xlu0 %211 }
 0x2a7   :  { %v144_v11 = vsel %vm143_vm4, %v140_v4, %v142_v10  ;;  %v145_v12 = vsel %vm143_vm4, %v142_v10, %v140_v4  ;;  %v650_v10 = vmov 2  }
 0x2a8   :  { %v164_v14 = vmul.f32 %v812_v5, %v145_v12  ;;  %v165_v16 = vmul.f32 %v814_v7, %v144_v11  ;;  %586 = vset.pattern.permute.xlu1 %v650_v10 }
 0x2aa   :  { %v175_v18 = vpop.permute.xlu1 %174  ;;  %v536_v19 = vpack.c.bf16 %v173_v17, %v165_v16  ;;  %v538_v20 = vpack.c.bf16 %v172_v13, %v164_v14  ;;  %v220_v54 = vpop.permute.xlu0 %219 }
 0x2ac   :  { %537 = vmatprep.subr.bf16.mxu0 %v536_v19 }
 0x2ad   :  { %539 = vmatpush1.bf16.msra.mxu0 %v538_v20 }
 0x2ae   :  { %v177_v24 = vpop.permute.xlu1 %176 }
 0x2af   :  { %v178_v25 = vsel %vm143_vm4, %v175_v18, %v177_v24  ;;  %v179_v26 = vsel %vm143_vm4, %v177_v24, %v175_v18 }
 0x2b0   :  { %v180_v27 = vmul.f32 %v179_v26, %v812_v5  ;;  %v181_v28 = vmul.f32 %v178_v25, %v814_v7 }
 0x2b2   :  { %v183_v32 = vpop.permute.xlu1 %182  ;;  %v540_v34 = vpack.c.bf16 %v770_v48, %v181_v28  ;;  %v542_v37 = vpack.c.bf16 %v767_v47, %v180_v27  ;;  %v546_v48 = vpack.c.bf16 %v792_v57, %v729_v29 }
 0x2b3   :  { %v187_v44 = vsel %vm186_vm5, %v183_v32, %v185_v23  ;;  %v188_v35 = vsel %vm186_vm5, %v185_v23, %v183_v32 }
 0x2b4   :  { %541 = vmatprep.subr.bf16.mxu0 %v540_v34  ;;  %v207_v30 = vmul.f32 %v841_v39, %v187_v44  ;;  %v208_v49 = vmul.f32 %v843_v42, %v188_v35 }
 0x2b5   :  { %543 = vmatpush1.bf16.msra.mxu0 %v542_v37 }
 0x2b6   :  { %545 = vmatprep.subr.bf16.mxu0 %v544_v43  ;;  %v210_v45 = vpop.permute.xlu1 %209 }
 0x2b7   :  { %v213_v46 = vsel %vm186_vm5, %v210_v45, %v212_v38  ;;  %v214_v47 = vsel %vm186_vm5, %v212_v38, %v210_v45 }
 0x2b8   :  { %v215_v50 = vmul.f32 %v213_v46, %v841_v39  ;;  %v216_v51 = vmul.f32 %v214_v47, %v843_v42 }
 0x2b9   :  { %547 = vmatpush1.bf16.msra.mxu0 %v546_v48 }
 0x2ba   :  { %v218_v55 = vpop.permute.xlu1 %217  ;;  %v548_v56 = vpack.c.bf16 %v216_v51, %v208_v49  ;;  %v550_v58 = vpack.c.bf16 %v215_v50, %v207_v30 }
 0x2bb   :  { %v222_v60 = vsel %vm186_vm5, %v220_v54, %v218_v55  ;;  %v221_v61 = vsel %vm186_vm5, %v218_v55, %v220_v54 }
 0x2bc   :  { %v224_v29 = vmul.f32 %v222_v60, %v843_v42  ;;  %549 = vmatprep.subr.bf16.mxu0 %v548_v56  ;;  %v223_v57 = vmul.f32 %v221_v61, %v841_v39 }
 0x2bd   :  { %551 = vmatpush1.bf16.msra.mxu0 %v550_v58 }
 0x2be   :  { %246 = vmatprep.subr.mxu0 %v224_v29 }
 0x2c1   :  { %247 = vmatpush1.msra.mxu0 %v223_v57 }
 0x2c2   :  { %533 = vmatmul.mubr.msk.f32.vlgmr.msra.gmra.mrb[0].mxu0 %vm226_vm6, %v225_v62 }
 0x395   :  { %v296_v63 = vpop.f32.mrb[0].mxu0 }
 0x396   :  { %v298_v2 = vpop.f32.mrb[1].mxu0  ;;  %v305_v3 = vmul.f32 %v296_v63, %v296_v63 }
 0x397   :  { %v306_v4 = vmul.f32 %v298_v2, %v298_v2  ;;  %v301_v8 = vadd.f32 %v298_v2, %v296_v63 }
 0x399   :  { %302 = vadd.xlane.f32.xlu1 %v301_v8  ;;  %v307_v9 = vadd.f32 %v306_v4, %v305_v3 }
 0x39b   :  { %308 = vadd.xlane.f32.xlu0 %v307_v9 }
 0x426   :  { %v303_v11 = vpop.xlane.xlu1 %302 }
 0x427   :  { %v304_v12 = vmul.f32 0.00390625, %v303_v11 }
 0x428   :  { %v309_v13 = vpop.xlane.xlu0 %308 }
 0x429   :  { %v311_v14 = vmul.f32 %v304_v12, %v304_v12  ;;  %v310_v16 = vmul.f32 0.00390625, %v309_v13 }
 0x42b   :  { %v312_v17 = vsub.f32 %v310_v16, %v311_v14 }
 0x42d   :  { %v313_v18 = vadd.f32 1e-05, %v312_v17 }
 0x42f   :  { %592 = vrsqrt.f32 %v313_v18 }
 0x439   :  { %v593_v19 = vpop.eup %592 }
 0x43a   :  { %v315_v20 = vmul.f32 %v593_v19, %v721_v15 }
 0x43c   :  { %324 = vperm.xlu1 %586, %v315_v20   ;;  %v316_v21 = vmul.f32 %v315_v20, %v304_v12 }
 0x43e   :  { %318 = vrot.lane.b32.xlu0 %v316_v21, %s645_s13 }
 0x440   :  { %587 = vset.pattern.permute.xlu1 %v651_v22 }
 0x4b0   :  { %v319_v23 = vpop.permute.xlu0 %318 }
 0x4b1   :  { %v321_v24 = vsub.f32 %v721_v15, %v319_v23 }
 0x4b3   :  { %331 = vperm.xlu1 %587, %v321_v24  }
 0x4b7   :  { %589 = vset.pattern.permute.xlu1 %v643_v6 }
 0x4bb   :  { %v325_v25 = vpop.permute.xlu1 %324 }
 0x4bc   :  { %v327_v26 = vmul.f32 %v325_v25, %v296_v63  ;;  %v328_v27 = vmul.f32 %v325_v25, %v298_v2 }
 0x532   :  { %v332_v28 = vpop.permute.xlu1 %331 }
 0x533   :  { %v334_v31 = vadd.f32 %v332_v28, %v327_v26  ;;  %v335_v33 = vadd.f32 %v332_v28, %v328_v27 }
 0x535   :  { %vm336_vm7 = vcmp.gt.f32.partialorder %v334_v31, 0.0  ;;  %vm337_vm8 = vcmp.gt.f32.partialorder %v335_v33, 0.0  ;;  %v338_v32 = vmul.f32 0.2, %v334_v31  ;;  %v339_v34 = vmul.f32 0.2, %v335_v33 }
 0x537   :  { %v873_v37 = vsel %vm337_vm8, %v335_v33, %v339_v34  ;;  %v875_v38 = vsel %vm336_vm7, %v334_v31, %v338_v32 }
 0x538   :  { %344 = vrot.lane.b32.xlu1 %v873_v37, %s645_s13  ;;  %342 = vrot.lane.b32.xlu0 %v875_v38, %s645_s13 }
 0x53c   :  { %352 = vrot.lane.b32.xlu1 %v873_v37, %s646_s2  ;;  %350 = vrot.lane.b32.xlu0 %v875_v38, %s646_s2 }
 0x540   :  { %368 = vrot.lane.b32.xlu1 %v873_v37, %s647_s14  ;;  %366 = vrot.lane.b32.xlu0 %v875_v38, %s647_s14 }
 0x5aa   :  { %v345_v6 = vpop.permute.xlu1 %344  ;;  %v343_v15 = vpop.permute.xlu0 %342 }
 0x5ab   :  { %v346_v43 = vsel %vm88_vm2, %v343_v15, %v345_v6  ;;  %v347_v44 = vsel %vm88_vm2, %v345_v6, %v343_v15 }
 0x5ac   :  { %v348_v35 = vmul.f32 %v347_v44, %v756_v40  ;;  %v349_v45 = vmul.f32 %v346_v43, %v758_v41  ;;  %v496_v40 = vld [vmem:[%s984_s5] sm:$0xff]  ;;  %v497_v41 = vld [vmem:[%s984_s5 + $0x8] sm:$0xff] }
 0x5ad   :  { %v406_v43 = vld [vmem:[%s983_s4] sm:$0xff]  ;;  %s616_s4 = scalar_lea.vmem %s522_s25, 512 }
 0x5ae   :  { %v353_v46 = vpop.permute.xlu1 %352  ;;  %358 = vrot.lane.b32.xlu0 %v348_v35, %s647_s14  ;;  %360 = vrot.lane.b32.xlu1 %v349_v45, %s647_s14  ;;  %v351_v47 = vpop.permute.xlu0 %350  ;;  %p617_p8 = scmp.ne.s32.totalorder %s522_s25, %s616_s4  ;;  %p622_p10 = scmp.lt.s32.totalorder %s616_s4, %s616_s4 }
 0x5af   :  { %v354_v48 = vsel %vm116_vm3, %v351_v47, %v353_v46  ;;  %v355_v30 = vsel %vm116_vm3, %v353_v46, %v351_v47 }
 0x5b0   :  { %v356_v49 = vmul.f32 %v354_v48, %v779_v52  ;;  %v357_v50 = vmul.f32 %v355_v30, %v781_v53  ;;  %p623_p11 = por %p622_p10, %p621_p9 }
 0x5b2   :  { %376 = vrot.lane.b32.xlu1 %v357_v50, %s647_s14  ;;  %374 = vrot.lane.b32.xlu0 %v356_v49, %s647_s14  ;;  %v369_v52 = vpop.permute.xlu1 %368  ;;  %v367_v53 = vpop.permute.xlu0 %366  ;;  %v560_v17 = vpack.c.bf16 %v357_v50, %v873_v37  ;;  %v562_v22 = vpack.c.bf16 %v356_v49, %v875_v38  ;;  %p624_p12 = pnand %p623_p11, %p617_p8 }
 0x5b3   :  { %v370_v51 = vsel %vm143_vm4, %v367_v53, %v369_v52  ;;  %v371_v54 = vsel %vm143_vm4, %v369_v52, %v367_v53 }
 0x5b4   :  { %v372_v61 = vmul.f32 %v371_v54, %v812_v5  ;;  %v373_v62 = vmul.f32 %v370_v51, %v814_v7 }
 0x5b6   :  { %392 = vrot.lane.b32.xlu1 %v873_v37, %s648_s15  ;;  %390 = vrot.lane.b32.xlu0 %v875_v38, %s648_s15 }
 0x5ba   :  { %384 = vrot.lane.b32.xlu1 %v349_v45, %s648_s15  ;;  %382 = vrot.lane.b32.xlu0 %v348_v35, %s648_s15 }
 0x5be   :  { %400 = vrot.lane.b32.xlu1 %v357_v50, %s648_s15  ;;  %398 = vrot.lane.b32.xlu0 %v356_v49, %s648_s15 }
 0x5c2   :  { %500 = vperm.xlu0 %588, %v496_v40   ;;  %505 = vperm.xlu1 %589, %v497_v41  }
 0x620   :  { %v361_v55 = vpop.permute.xlu1 %360  ;;  %v359_v56 = vpop.permute.xlu0 %358 }
 0x621   :  { %v362_v58 = vsel %vm143_vm4, %v359_v56, %v361_v55  ;;  %v363_v60 = vsel %vm143_vm4, %v361_v55, %v359_v56 }
 0x622   :  { %v364_v29 = vmul.f32 %v363_v60, %v812_v5  ;;  %v365_v57 = vmul.f32 %v362_v58, %v814_v7 }
 0x624   :  { %v377_v63 = vpop.permute.xlu1 %376  ;;  %v375_v2 = vpop.permute.xlu0 %374  ;;  %v552_v3 = vpack.c.bf16 %v373_v62, %v365_v57  ;;  %v554_v4 = vpack.c.bf16 %v372_v61, %v364_v29 }
 0x625   :  { %v378_v8 = vsel %vm143_vm4, %v375_v2, %v377_v63  ;;  %v379_v9 = vsel %vm143_vm4, %v377_v63, %v375_v2 }
 0x626   :  { %v380_v10 = vmul.f32 %v379_v9, %v812_v5  ;;  %v381_v11 = vmul.f32 %v378_v8, %v814_v7  ;;  %553 = vmatprep.subr.bf16.mxu1 %v552_v3 }
 0x627   :  { %555 = vmatpush1.bf16.msra.mxu1 %v554_v4 }
 0x628   :  { %v393_v12 = vpop.permute.xlu1 %392  ;;  %v391_v13 = vpop.permute.xlu0 %390  ;;  %v556_v14 = vpack.c.bf16 %v349_v45, %v381_v11  ;;  %v558_v16 = vpack.c.bf16 %v348_v35, %v380_v10 }
 0x629   :  { %v394_v18 = vsel %vm186_vm5, %v391_v13, %v393_v12  ;;  %v395_v19 = vsel %vm186_vm5, %v393_v12, %v391_v13 }
 0x62a   :  { %557 = vmatprep.subr.bf16.mxu1 %v556_v14  ;;  %v396_v23 = vmul.f32 %v394_v18, %v841_v39  ;;  %v397_v24 = vmul.f32 %v395_v19, %v843_v42 }
 0x62b   :  { %559 = vmatpush1.bf16.msra.mxu1 %v558_v16 }
 0x62c   :  { %v385_v20 = vpop.permute.xlu1 %384  ;;  %561 = vmatprep.subr.bf16.mxu1 %v560_v17  ;;  %v383_v5 = vpop.permute.xlu0 %382 }
 0x62d   :  { %v386_v7 = vsel %vm186_vm5, %v383_v5, %v385_v20  ;;  %v387_v21 = vsel %vm186_vm5, %v385_v20, %v383_v5 }
 0x62e   :  { %v388_v25 = vmul.f32 %v386_v7, %v841_v39  ;;  %v389_v26 = vmul.f32 %v387_v21, %v843_v42 }
 0x62f   :  { %563 = vmatpush1.bf16.msra.mxu1 %v562_v22 }
 0x630   :  { %v401_v27 = vpop.permute.xlu1 %400  ;;  %v399_v28 = vpop.permute.xlu0 %398  ;;  %v564_v31 = vpack.c.bf16 %v397_v24, %v389_v26  ;;  %v566_v33 = vpack.c.bf16 %v396_v23, %v388_v25 }
 0x631   :  { %v402_v32 = vsel %vm186_vm5, %v399_v28, %v401_v27  ;;  %v403_v34 = vsel %vm186_vm5, %v401_v27, %v399_v28 }
 0x632   :  { %v404_v37 = vmul.f32 %v402_v32, %v841_v39  ;;  %v405_v38 = vmul.f32 %v403_v34, %v843_v42  ;;  %565 = vmatprep.subr.bf16.mxu1 %v564_v31 }
 0x633   :  { %567 = vmatpush1.bf16.msra.mxu1 %v566_v33 }
 0x634   :  { %v568_v6 = vpack.c.bf16 %v709_v1, %v405_v38  ;;  %v570_v15 = vpack.c.bf16 %v704_v0, %v404_v37 }
 0x636   :  { %569 = vmatprep.subr.bf16.mxu1 %v568_v6 }
 0x637   :  { %571 = vmatpush1.bf16.msra.mxu1 %v570_v15 }
 0x63a   :  { %534 = vmatmul.mubr.msk.f32.vlgmr.msra.gmra.mrb[0].mxu1 %vm408_vm9, %v406_v43 }
 0x63b   :  { %485 = vmatprep.mubr.f32.mxu1 %v649_v59 }
 0x63e   :  { %535 = vmatmul.mubr.msk.f32.gmra.mrb[2].mxu1 %vm408_vm9, %v407_v36 }
 0x641   :  { %v501_v42 = vpop.permute.xlu0 %500  ;;  %v506_v47 = vpop.permute.xlu1 %505 }
 0x70d   :  { %v481_v39 = vpop.f32.mrb[0].mxu1 }
 0x70e   :  { %v492_v1 = vmul.f32 0.70710677, %v481_v39  ;;  %v483_v44 = vpop.f32.mrb[1].mxu1 }
 0x70f   :  { %v493_v0 = vmul.f32 0.70710677, %v483_v44 }
 0x710   :  { %v508_v35 = vadd.f32 %v501_v42, %v492_v1 }
 0x711   :  { %v509_v45 = vadd.f32 %v501_v42, %v493_v0  ;;  %v487_v46 = vpop.f32.mrb[2].mxu1 }
 0x712   :  { %512 = vst [vmem:[#allocation5] sm:$0xff] %v508_v35  ;;  %v494_v48 = vmul.f32 0.70710677, %v487_v46  ;;  %v489_v30 = vpop.f32.mrb[3].mxu1 }
 0x713   :  { %513 = vst [vmem:[#allocation5 + $0x8] sm:$0xff] %v509_v45  ;;  %v495_v59 = vmul.f32 0.70710677, %v489_v30 }
 0x714   :  { %v510_v49 = vadd.f32 %v506_v47, %v494_v48 }
 0x715   :  { %v511_v50 = vadd.f32 %v506_v47, %v495_v59 }
 0x716   :  { %514 = vst [vmem:[#allocation5 + $0x10] sm:$0xff] %v510_v49 }
 0x717   :  { %515 = vst [vmem:[#allocation5 + $0x18] sm:$0xff] %v511_v50 }
 0x718   :  { %627 = shalt.err (!%p624_p12)
}
 0x719   :  { %s628_s28 = scalar_lea.hbm %s985_s6, 512 }
 0x71a   :  { %p629_p13 = scmp.ne.s32.totalorder %s985_s6, %s628_s28  ;;  %p632_p0 = scmp.lt.u32.totalorder %s628_s28, %s985_s6 }
 0x71c   :  { %p634_p1 = pnand %p632_p0, %p629_p13 }
 0x71e   :  { %637 = shalt.err (!%p634_p1)
}
 0x71f   :  { %s653_s9 = smov 256  }
 0x720   :  { %527 = dma.vmem_to_hbm [thread:$0]  %s522_s25, 512, %s985_s6, [#allocation4], %s653_s9, %s653_s9, %s647_s14  }
 0x721   :  { %640 = dma.done.wait [#allocation4], 512  }
 0x722   :  { %641 = vsyncadd [#allocation4], 4294966784 }
 0x723   :  { %531 = vsyncpa [#allocation3], 1 }
 0x724   :  { %532 = vsyncpa [#allocation4], 1 }

</bundles_post_ra>
